<compile_context>
chip_gen: v6e
topology: v6e:2x2x1
jax: 0.10.0
libtpu: 0.0.40
codegen_flags: <defaults>
</compile_context>

<pallas_src>
import functools

import jax
import jax.numpy as jnp
from jax.experimental import pallas as pl
from jax.experimental.pallas import tpu as pltpu


def _round_up(n, m):
    return ((n + m - 1) // m) * m


def _keep_mask(shape, key, thresh):
    """Per-element keep mask, P(keep) = 1 - thresh / 2**24.

    Counter-based hash using only int32 add/mul/xor/shift/and so it lowers on
    the TPU VPU and in CPU interpret mode (no TPU PRNG primitives).
    `(x >> k) & mask` reproduces a logical right shift from the arithmetic one.
    """
    r = jax.lax.broadcasted_iota(jnp.int32, shape, 0)
    c = jax.lax.broadcasted_iota(jnp.int32, shape, 1)
    x = key + r * jnp.int32(0x61C88647) + c * jnp.int32(0x7FEB352D)
    x = (x ^ ((x >> 16) & 0xFFFF)) * jnp.int32(0x27D4EB2F)
    x = (x ^ ((x >> 13) & 0x7FFFF)) * jnp.int32(0x165667B1)
    x = x ^ ((x >> 16) & 0xFFFF)
    return (x & 0x00FFFFFF) >= thresh


def _block_kernel(seed_ref, x_ref, w1_ref, b1_ref, w2_ref, b2_ref, o_ref,
                  *, thresh, training):
    drop_active = bool(training) and thresh > 0

    # contract feature axes: x @ W^T (torch.nn.Linear), no transposed copy of W
    dn = (((1,), (1,)), ((), ()))
    mm_dtype = w1_ref.dtype  # bf16 weights (cast once in the wrapper)

    # activate1 -> linear1
    h = jnp.maximum(x_ref[...], 0.0)
    h1 = jax.lax.dot_general(h.astype(mm_dtype), w1_ref[...],
                             dimension_numbers=dn,
                             preferred_element_type=jnp.float32)
    h1 = h1 + b1_ref[...]

    if drop_active:
        # per-tile key so batch tiles get independent masks; per-layer salts
        key = seed_ref[0] + pl.program_id(0) * jnp.int32(0x01000193)
        keep1 = _keep_mask(h1.shape, key ^ jnp.int32(0x3C6EF35F), thresh)
        h1 = jnp.where(keep1, h1, 0.0)  # 1/(1-p) scale folded into w2/b2

    # activate2 -> linear2 (w2/b2 already carry the folded dropout scales)
    h2 = jnp.maximum(h1, 0.0)
    y = jax.lax.dot_general(h2.astype(mm_dtype), w2_ref[...],
                            dimension_numbers=dn,
                            preferred_element_type=jnp.float32)
    y = y + b2_ref[...]

    if drop_active:
        keep2 = _keep_mask(y.shape, key ^ jnp.int32(0x1B873593), thresh)
        y = jnp.where(keep2, y, 0.0)

    o_ref[...] = y.astype(o_ref.dtype)


def basic_dropout_block(x, w1, b1, w2, b2, seed, *, droptol, training=True,
                        block_rows=256, compute_dtype=jnp.bfloat16):
    """x: (batch, width) f32.  w1/w2: (width, width) like torch Linear.weight.
    b1/b2: (width,).  seed: int32 scalar for the dropout hash."""
    assert 0.0 <= float(droptol) < 1.0, "droptol must be in [0, 1)"
    batch, width = x.shape
    assert w1.shape == (width, width) and w2.shape == (width, width)

    # lane/sublane aligned padded shapes
    width_p = _round_up(width, 128)
    block_rows = _round_up(int(block_rows), 8)
    tm = min(block_rows, _round_up(batch, 8))
    batch_p = _round_up(batch, tm)
    grid = (batch_p // tm,)

    # Fold dropout scales into the second linear:
    #   mask2*s2*( (s1*relu(mask1*y1)) @ W2^T + b2 )
    # = mask2*( relu(mask1*y1) @ (s1*s2*W2)^T + s2*b2 )
    if training and droptol > 0.0:
        s = 1.0 / (1.0 - float(droptol))
        w2_eff = w2 * jnp.float32(s * s)
        b2_eff = b2 * jnp.float32(s)
    else:
        w2_eff, b2_eff = w2, b2

    def pad2(a, rows, cols):
        return jnp.pad(a, ((0, rows - a.shape[0]), (0, cols - a.shape[1])))

    xp = pad2(x.astype(jnp.float32), batch_p, width_p)
    w1p = pad2(w1.astype(jnp.float32), width_p, width_p).astype(compute_dtype)
    w2p = pad2(w2_eff.astype(jnp.float32), width_p, width_p).astype(compute_dtype)
    b1p = jnp.pad(b1.astype(jnp.float32), (0, width_p - width)).reshape(1, width_p)
    b2p = jnp.pad(b2_eff.astype(jnp.float32), (0, width_p - width)).reshape(1, width_p)

    seed_arr = jnp.asarray([seed], dtype=jnp.int32)
    thresh = int(round(float(droptol) * (1 << 24)))

    kernel = functools.partial(_block_kernel, thresh=thresh,
                               training=bool(training))

    # VMEM budget: resident weights (double-buffered) + io tiles + headroom
    bpe_w = jnp.dtype(compute_dtype).itemsize
    est = (2 * width_p * width_p * bpe_w * 2     # two resident weight slabs
           + 2 * tm * width_p * 4 * 2            # x / out tiles, double-buffered
           + 2 * width_p * 4 * 2                 # biases
           + 8 * tm * width_p * 4)               # intermediate values
    vmem_limit = int(min(64 * 2 ** 20, max(32 * 2 ** 20, int(est * 1.25))))

    out = pl.pallas_call(
        kernel,
        out_shape=jax.ShapeDtypeStruct((batch_p, width_p), jnp.float32),
        grid=grid,
        in_specs=[
            pl.BlockSpec(memory_space=pltpu.MemorySpace.SMEM),      # seed
            pl.BlockSpec((tm, width_p), lambda i: (i, 0)),          # x tile
            pl.BlockSpec((width_p, width_p), lambda i: (0, 0)),     # w1 resident
            pl.BlockSpec((1, width_p), lambda i: (0, 0)),           # b1 resident
            pl.BlockSpec((width_p, width_p), lambda i: (0, 0)),     # w2 resident
            pl.BlockSpec((1, width_p), lambda i: (0, 0)),           # b2 resident
        ],
        out_specs=pl.BlockSpec((tm, width_p), lambda i: (i, 0)),
        compiler_params=pltpu.CompilerParams(
            dimension_semantics=("parallel",),
            vmem_limit_bytes=vmem_limit),
    )(seed_arr, xp, w1p, b1p, w2p, b2p)

    return out[:batch, :width].astype(x.dtype)


def _torch_like_linear_init(key, width):
    """Deterministic init mimicking torch.nn.Linear default (uniform +-1/sqrt(in))."""
    kw, kb = jax.random.split(key)
    bound = 1.0 / jnp.sqrt(jnp.float32(width))
    w = jax.random.uniform(kw, (width, width), jnp.float32, -bound, bound)
    b = jax.random.uniform(kb, (width,), jnp.float32, -bound, bound)
    return w, b


def _ref_eval(x, w1, b1, w2, b2):
    """Pure-JAX eval-mode reference using the same bf16-matmul / f32-acc recipe."""
    cd = jnp.bfloat16
    h = jnp.maximum(x, 0.0)
    h = jnp.dot(h.astype(cd), w1.astype(cd).T,
                preferred_element_type=jnp.float32) + b1
    h = jnp.maximum(h, 0.0)
    h = jnp.dot(h.astype(cd), w2.astype(cd).T,
                preferred_element_type=jnp.float32) + b2
    return h


if __name__ == "__main__":
    droptol = 0.1
    root = jax.random.PRNGKey(0)
    kx, k1, k2 = jax.random.split(root, 3)

    # primary (lane-aligned) shape
    batch, width = 16, 128
    x = jax.random.normal(kx, (batch, width), jnp.float32)
    w1, b1 = _torch_like_linear_init(k1, width)
    w2, b2 = _torch_like_linear_init(k2, width)

    # training mode (dropout active)
    y_train = basic_dropout_block(x, w1, b1, w2, b2, seed=1234,
                                  droptol=droptol, training=True)
    jax.block_until_ready(y_train)
    assert y_train.shape == (batch, width)
    assert bool(jnp.all(jnp.isfinite(y_train)))

    # eval mode (dropout = identity) vs pure-JAX reference
    y_eval = basic_dropout_block(x, w1, b1, w2, b2, seed=0,
                                 droptol=droptol, training=False)
    jax.block_until_ready(y_eval)
    assert jnp.allclose(y_eval, _ref_eval(x, w1, b1, w2, b2),
                        atol=2e-2, rtol=2e-2)

    # small ragged shape (original demo size) -> exercises the padding path
    batch_s, width_s = 8, 32
    xs = jax.random.normal(kx, (batch_s, width_s), jnp.float32)
    ws1, bs1 = _torch_like_linear_init(k1, width_s)
    ws2, bs2 = _torch_like_linear_init(k2, width_s)

    ys_train = basic_dropout_block(xs, ws1, bs1, ws2, bs2, seed=7,
                                   droptol=droptol, training=True)
    jax.block_until_ready(ys_train)
    assert ys_train.shape == (batch_s, width_s)
    assert bool(jnp.all(jnp.isfinite(ys_train)))

    ys_eval = basic_dropout_block(xs, ws1, bs1, ws2, bs2, seed=0,
                                  droptol=droptol, training=False)
    jax.block_until_ready(ys_eval)
    assert jnp.allclose(ys_eval, _ref_eval(xs, ws1, bs1, ws2, bs2),
                        atol=2e-2, rtol=2e-2)

    print("KERNEL_OK")
</pallas_src>

<mosaic_0001>
module attributes {stable_mosaic.version = 11 : i64} {
  func.func @_block_kernel(%arg0: i32, %arg1: memref<1xi32, #tpu.memory_space<smem>>, %arg2: memref<16x128xf32, #tpu.memory_space<vmem>>, %arg3: memref<128x128xbf16, #tpu.memory_space<vmem>>, %arg4: memref<1x128xf32, #tpu.memory_space<vmem>>, %arg5: memref<128x128xbf16, #tpu.memory_space<vmem>>, %arg6: memref<1x128xf32, #tpu.memory_space<vmem>>, %arg7: memref<16x128xf32, #tpu.memory_space<vmem>>) attributes {dimension_semantics = [#tpu.dimension_semantics<parallel>], iteration_bounds = array<i64: 1>, scalar_prefetch = 0 : i64, scratch_operands = 0 : i64, tpu.core_type = #tpu.core_type<tc>, window_params = [{transform_indices = @transform_0, window_bounds = array<i64: 1>}, {transform_indices = @transform_1, window_bounds = array<i64: 16, 128>}, {pipeline_mode = #tpu.pipeline_mode<synchronous>, transform_indices = @transform_2, window_bounds = array<i64: 128, 128>}, {pipeline_mode = #tpu.pipeline_mode<synchronous>, transform_indices = @transform_3, window_bounds = array<i64: 1, 128>}, {pipeline_mode = #tpu.pipeline_mode<synchronous>, transform_indices = @transform_4, window_bounds = array<i64: 128, 128>}, {pipeline_mode = #tpu.pipeline_mode<synchronous>, transform_indices = @transform_5, window_bounds = array<i64: 1, 128>}, {transform_indices = @transform_6, window_bounds = array<i64: 16, 128>}]} {
    %c0 = arith.constant 0 : index
    %c0_0 = arith.constant 0 : index
    %0 = vector.load %arg2[%c0, %c0_0] : memref<16x128xf32, #tpu.memory_space<vmem>>, vector<16x128xf32>
    %cst = arith.constant 0.000000e+00 : f32
    %1 = vector.broadcast %cst : f32 to vector<16x128xf32>
    %2 = arith.maximumf %0, %1 : vector<16x128xf32>
    %3 = arith.truncf %2 : vector<16x128xf32> to vector<16x128xbf16>
    %c0_1 = arith.constant 0 : index
    %c0_2 = arith.constant 0 : index
    %4 = vector.load %arg3[%c0_1, %c0_2] : memref<128x128xbf16, #tpu.memory_space<vmem>>, vector<128x128xbf16>
    %cst_3 = arith.constant dense<0.000000e+00> : vector<16x128xf32>
    %5 = tpu.matmul %3, %4, %cst_3 {dimension_numbers = #tpu.dot_dimension_numbers<[1], [1], [0], [0], [0, 0, 1, 0], [], []>} : vector<16x128xbf16>, vector<128x128xbf16>, vector<16x128xf32> -> vector<16x128xf32>
    %c0_4 = arith.constant 0 : index
    %c0_5 = arith.constant 0 : index
    %6 = vector.load %arg4[%c0_4, %c0_5] : memref<1x128xf32, #tpu.memory_space<vmem>>, vector<1x128xf32>
    %7 = vector.broadcast %6 : vector<1x128xf32> to vector<16x128xf32>
    %8 = arith.addf %5, %7 : vector<16x128xf32>
    %c0_6 = arith.constant 0 : index
    %9 = memref.load %arg1[%c0_6] : memref<1xi32, #tpu.memory_space<smem>>
    %c16777619_i32 = arith.constant 16777619 : i32
    %10 = arith.muli %arg0, %c16777619_i32 : i32
    %11 = arith.addi %9, %10 : i32
    %c1013904223_i32 = arith.constant 1013904223 : i32
    %12 = arith.xori %11, %c1013904223_i32 : i32
    %13 = tpu.iota {dimensions = array<i32: 0>} : vector<16x128xi32>
    %14 = tpu.iota {dimensions = array<i32: 1>} : vector<16x128xi32>
    %c1640531527_i32 = arith.constant 1640531527 : i32
    %15 = vector.broadcast %c1640531527_i32 : i32 to vector<16x128xi32>
    %16 = arith.muli %13, %15 : vector<16x128xi32>
    %17 = vector.broadcast %12 : i32 to vector<16x128xi32>
    %18 = arith.addi %17, %16 : vector<16x128xi32>
    %c2146121005_i32 = arith.constant 2146121005 : i32
    %19 = vector.broadcast %c2146121005_i32 : i32 to vector<16x128xi32>
    %20 = arith.muli %14, %19 : vector<16x128xi32>
    %21 = arith.addi %18, %20 : vector<16x128xi32>
    %c16_i32 = arith.constant 16 : i32
    %22 = vector.broadcast %c16_i32 : i32 to vector<16x128xi32>
    %23 = arith.shrsi %21, %22 : vector<16x128xi32>
    %c65535_i32 = arith.constant 65535 : i32
    %24 = vector.broadcast %c65535_i32 : i32 to vector<16x128xi32>
    %25 = arith.andi %23, %24 : vector<16x128xi32>
    %26 = arith.xori %21, %25 : vector<16x128xi32>
    %c668265263_i32 = arith.constant 668265263 : i32
    %27 = vector.broadcast %c668265263_i32 : i32 to vector<16x128xi32>
    %28 = arith.muli %26, %27 : vector<16x128xi32>
    %c13_i32 = arith.constant 13 : i32
    %29 = vector.broadcast %c13_i32 : i32 to vector<16x128xi32>
    %30 = arith.shrsi %28, %29 : vector<16x128xi32>
    %c524287_i32 = arith.constant 524287 : i32
    %31 = vector.broadcast %c524287_i32 : i32 to vector<16x128xi32>
    %32 = arith.andi %30, %31 : vector<16x128xi32>
    %33 = arith.xori %28, %32 : vector<16x128xi32>
    %c374761393_i32 = arith.constant 374761393 : i32
    %34 = vector.broadcast %c374761393_i32 : i32 to vector<16x128xi32>
    %35 = arith.muli %33, %34 : vector<16x128xi32>
    %c16_i32_7 = arith.constant 16 : i32
    %36 = vector.broadcast %c16_i32_7 : i32 to vector<16x128xi32>
    %37 = arith.shrsi %35, %36 : vector<16x128xi32>
    %c65535_i32_8 = arith.constant 65535 : i32
    %38 = vector.broadcast %c65535_i32_8 : i32 to vector<16x128xi32>
    %39 = arith.andi %37, %38 : vector<16x128xi32>
    %40 = arith.xori %35, %39 : vector<16x128xi32>
    %c16777215_i32 = arith.constant 16777215 : i32
    %41 = vector.broadcast %c16777215_i32 : i32 to vector<16x128xi32>
    %42 = arith.andi %40, %41 : vector<16x128xi32>
    %c1677722_i32 = arith.constant 1677722 : i32
    %43 = vector.broadcast %c1677722_i32 : i32 to vector<16x128xi32>
    %44 = arith.cmpi sge, %42, %43 : vector<16x128xi32>
    %cst_9 = arith.constant 0.000000e+00 : f32
    %45 = vector.broadcast %cst_9 : f32 to vector<16x128xf32>
    %46 = arith.select %44, %8, %45 : vector<16x128xi1>, vector<16x128xf32>
    %cst_10 = arith.constant 0.000000e+00 : f32
    %47 = vector.broadcast %cst_10 : f32 to vector<16x128xf32>
    %48 = arith.maximumf %46, %47 : vector<16x128xf32>
    %49 = arith.truncf %48 : vector<16x128xf32> to vector<16x128xbf16>
    %c0_11 = arith.constant 0 : index
    %c0_12 = arith.constant 0 : index
    %50 = vector.load %arg5[%c0_11, %c0_12] : memref<128x128xbf16, #tpu.memory_space<vmem>>, vector<128x128xbf16>
    %cst_13 = arith.constant dense<0.000000e+00> : vector<16x128xf32>
    %51 = tpu.matmul %49, %50, %cst_13 {dimension_numbers = #tpu.dot_dimension_numbers<[1], [1], [0], [0], [0, 0, 1, 0], [], []>} : vector<16x128xbf16>, vector<128x128xbf16>, vector<16x128xf32> -> vector<16x128xf32>
    %c0_14 = arith.constant 0 : index
    %c0_15 = arith.constant 0 : index
    %52 = vector.load %arg6[%c0_14, %c0_15] : memref<1x128xf32, #tpu.memory_space<vmem>>, vector<1x128xf32>
    %53 = vector.broadcast %52 : vector<1x128xf32> to vector<16x128xf32>
    %54 = arith.addf %51, %53 : vector<16x128xf32>
    %c461845907_i32 = arith.constant 461845907 : i32
    %55 = arith.xori %11, %c461845907_i32 : i32
    %56 = tpu.iota {dimensions = array<i32: 0>} : vector<16x128xi32>
    %57 = tpu.iota {dimensions = array<i32: 1>} : vector<16x128xi32>
    %c1640531527_i32_16 = arith.constant 1640531527 : i32
    %58 = vector.broadcast %c1640531527_i32_16 : i32 to vector<16x128xi32>
    %59 = arith.muli %56, %58 : vector<16x128xi32>
    %60 = vector.broadcast %55 : i32 to vector<16x128xi32>
    %61 = arith.addi %60, %59 : vector<16x128xi32>
    %c2146121005_i32_17 = arith.constant 2146121005 : i32
    %62 = vector.broadcast %c2146121005_i32_17 : i32 to vector<16x128xi32>
    %63 = arith.muli %57, %62 : vector<16x128xi32>
    %64 = arith.addi %61, %63 : vector<16x128xi32>
    %c16_i32_18 = arith.constant 16 : i32
    %65 = vector.broadcast %c16_i32_18 : i32 to vector<16x128xi32>
    %66 = arith.shrsi %64, %65 : vector<16x128xi32>
    %c65535_i32_19 = arith.constant 65535 : i32
    %67 = vector.broadcast %c65535_i32_19 : i32 to vector<16x128xi32>
    %68 = arith.andi %66, %67 : vector<16x128xi32>
    %69 = arith.xori %64, %68 : vector<16x128xi32>
    %c668265263_i32_20 = arith.constant 668265263 : i32
    %70 = vector.broadcast %c668265263_i32_20 : i32 to vector<16x128xi32>
    %71 = arith.muli %69, %70 : vector<16x128xi32>
    %c13_i32_21 = arith.constant 13 : i32
    %72 = vector.broadcast %c13_i32_21 : i32 to vector<16x128xi32>
    %73 = arith.shrsi %71, %72 : vector<16x128xi32>
    %c524287_i32_22 = arith.constant 524287 : i32
    %74 = vector.broadcast %c524287_i32_22 : i32 to vector<16x128xi32>
    %75 = arith.andi %73, %74 : vector<16x128xi32>
    %76 = arith.xori %71, %75 : vector<16x128xi32>
    %c374761393_i32_23 = arith.constant 374761393 : i32
    %77 = vector.broadcast %c374761393_i32_23 : i32 to vector<16x128xi32>
    %78 = arith.muli %76, %77 : vector<16x128xi32>
    %c16_i32_24 = arith.constant 16 : i32
    %79 = vector.broadcast %c16_i32_24 : i32 to vector<16x128xi32>
    %80 = arith.shrsi %78, %79 : vector<16x128xi32>
    %c65535_i32_25 = arith.constant 65535 : i32
    %81 = vector.broadcast %c65535_i32_25 : i32 to vector<16x128xi32>
    %82 = arith.andi %80, %81 : vector<16x128xi32>
    %83 = arith.xori %78, %82 : vector<16x128xi32>
    %c16777215_i32_26 = arith.constant 16777215 : i32
    %84 = vector.broadcast %c16777215_i32_26 : i32 to vector<16x128xi32>
    %85 = arith.andi %83, %84 : vector<16x128xi32>
    %c1677722_i32_27 = arith.constant 1677722 : i32
    %86 = vector.broadcast %c1677722_i32_27 : i32 to vector<16x128xi32>
    %87 = arith.cmpi sge, %85, %86 : vector<16x128xi32>
    %cst_28 = arith.constant 0.000000e+00 : f32
    %88 = vector.broadcast %cst_28 : f32 to vector<16x128xf32>
    %89 = arith.select %87, %54, %88 : vector<16x128xi1>, vector<16x128xf32>
    %c0_29 = arith.constant 0 : index
    %c0_30 = arith.constant 0 : index
    %90 = vector.load %arg7[%c0_29, %c0_30] : memref<16x128xf32, #tpu.memory_space<vmem>>, vector<16x128xf32>
    tpu.vector_store %arg7[%c0_29, %c0_30], %89 {strides = array<i32>} : memref<16x128xf32, #tpu.memory_space<vmem>>, vector<16x128xf32>,
    return
  }
  func.func @transform_0(%arg0: i32) -> i32 {
    %c0_i32 = arith.constant 0 : i32
    %c0_i32_0 = arith.constant 0 : i32
    return %c0_i32 : i32
  }
  func.func @transform_1(%arg0: i32) -> (i32, i32) {
    %c0_i32 = arith.constant 0 : i32
    %c0_i32_0 = arith.constant 0 : i32
    return %arg0, %c0_i32 : i32, i32
  }
  func.func @transform_2(%arg0: i32) -> (i32, i32) {
    %c0_i32 = arith.constant 0 : i32
    %c0_i32_0 = arith.constant 0 : i32
    %c0_i32_1 = arith.constant 0 : i32
    return %c0_i32, %c0_i32_0 : i32, i32
  }
  func.func @transform_3(%arg0: i32) -> (i32, i32) {
    %c0_i32 = arith.constant 0 : i32
    %c0_i32_0 = arith.constant 0 : i32
    %c0_i32_1 = arith.constant 0 : i32
    return %c0_i32, %c0_i32_0 : i32, i32
  }
  func.func @transform_4(%arg0: i32) -> (i32, i32) {
    %c0_i32 = arith.constant 0 : i32
    %c0_i32_0 = arith.constant 0 : i32
    %c0_i32_1 = arith.constant 0 : i32
    return %c0_i32, %c0_i32_0 : i32, i32
  }
  func.func @transform_5(%arg0: i32) -> (i32, i32) {
    %c0_i32 = arith.constant 0 : i32
    %c0_i32_0 = arith.constant 0 : i32
    %c0_i32_1 = arith.constant 0 : i32
    return %c0_i32, %c0_i32_0 : i32, i32
  }
  func.func @transform_6(%arg0: i32) -> (i32, i32) {
    %c0_i32 = arith.constant 0 : i32
    %c0_i32_0 = arith.constant 0 : i32
    return %arg0, %c0_i32 : i32, i32
  }
}

</mosaic_0001>

<bundles_post_ra>
// kernel: tpu_custom_call.1
= control target key start
LH: loop header
LB: loop body
LE: loop exit
PB: predicated region body
PF: predicated region fallthrough
CT: control target
= control target key end

     0   :  { %12 = vsyncpa [#allocation4], 0  ;;  %s673_s0 = inlined_call_operand.<no memory space> [shape: s32[1], index: 0, kind: input, shape index: {}]   ;;  %s674_s1 = inlined_call_operand.hbm [shape: f32[16,128], index: 1, kind: input, shape index: {}]   ;;  %s675_s2 = inlined_call_operand.hbm [shape: bf16[128,128], index: 2, kind: input, shape index: {}]   ;;  %s676_s3 = inlined_call_operand.vmem [shape: f32[1,128], index: 3, kind: input, shape index: {}]   ;;  %s677_s4 = inlined_call_operand.hbm [shape: bf16[128,128], index: 4, kind: input, shape index: {}]   ;;  %s678_s5 = inlined_call_operand.vmem [shape: f32[1,128], index: 5, kind: input, shape index: {}]   ;;  %s679_s6 = inlined_call_operand.hbm [shape: f32[16,128], index: 6, kind: output, shape index: {}]  }
   0x1   :  { %13 = vsyncpa [#allocation7], 0 }
   0x2   :  { %14 = vsyncpa [#allocation5], 0  ;;  %s598_s21 = smov [#allocation6]  }
   0x3   :  { %s34_s22 = sshll.u32 %s598_s21, 4  ;;  %s35_s22 = int_to_ptr.vmem [resolvable:$true] %s34_s22 }
   0x4   :  { %s520_s23 = scalar_lea.vmem %s35_s22, 1024  ;;  %p525_p1 = scmp.lt.s32.totalorder %s35_s22, %s35_s22 }
   0x5   :  { %p521_p0 = scmp.ne.s32.totalorder %s35_s22, %s520_s23  ;;  %p526_p2 = scmp.lt.s32.totalorder %s520_s23, %s520_s23 }
   0x7   :  { %p527_p3 = por %p526_p2, %p525_p1 }
   0x9   :  { %p528_p4 = pnand %p527_p3, %p521_p0 }
   0xb   :  { %531 = shalt.err (!%p528_p4)
}
   0xc   :  { %s599_s24 = smov 64   ;;  %s600_s25 = smov 4  }
   0xd   :  { %40 = dma.hbm_to_vmem [thread:$0]  %s675_s2, 1024, %s35_s22, [#allocation7], %s599_s24, %s599_s24, %s600_s25  }
   0xe   :  { %s601_s28 = smov [#allocation3]  }
   0xf   :  { %s22_s29 = sshll.u32 %s601_s28, 4  ;;  %s23_s29 = int_to_ptr.vmem [resolvable:$true] %s22_s29 }
  0x10   :  { %s540_s30 = scalar_lea.vmem %s23_s29, 256  ;;  %p545_p6 = scmp.lt.s32.totalorder %s23_s29, %s23_s29 }
  0x11   :  { %p541_p5 = scmp.ne.s32.totalorder %s23_s29, %s540_s30  ;;  %p546_p7 = scmp.lt.s32.totalorder %s540_s30, %s540_s30 }
  0x13   :  { %p547_p8 = por %p546_p7, %p545_p6 }
  0x15   :  { %p548_p9 = pnand %p547_p8, %p541_p5 }
  0x17   :  { %551 = shalt.err (!%p548_p9)
}
  0x18   :  { %s602_s7 = smov 128   ;;  %s603_s8 = smov 8  }
  0x19   :  { %28 = dma.hbm_to_vmem [thread:$0]  %s674_s1, 256, %s23_s29, [#allocation4], %s602_s7, %s602_s7, %s603_s8  }
  0x1a   :  { %s604_s2 = smov [#allocation8]  }
  0x1b   :  { %s48_s11 = sshll.u32 %s604_s2, 4  ;;  %s49_s11 = int_to_ptr.vmem [resolvable:$true] %s48_s11 }
  0x1c   :  { %s560_s12 = scalar_lea.vmem %s49_s11, 1024  ;;  %p565_p11 = scmp.lt.s32.totalorder %s49_s11, %s49_s11 }
  0x1d   :  { %p561_p10 = scmp.ne.s32.totalorder %s49_s11, %s560_s12  ;;  %p566_p12 = scmp.lt.s32.totalorder %s560_s12, %s560_s12 }
  0x1f   :  { %p567_p13 = por %p566_p12, %p565_p11 }
  0x21   :  { %p568_p0 = pnand %p567_p13, %p561_p10 }
  0x23   :  { %571 = shalt.err (!%p568_p0)
}
  0x24   :  { %54 = dma.hbm_to_vmem [thread:$0]  %s677_s4, 1024, %s49_s11, [#allocation7], %s599_s24, %s599_s24, %s600_s25  }
  0x25   :  { %592 = dma.done.wait [#allocation4], 256  }
  0x26   :  { %593 = vsyncadd [#allocation4], 4294967040 }
  0x27   :  { %594 = dma.done.wait [#allocation7], 2048  }
  0x28   :  { %595 = vsyncadd [#allocation7], 4294965248  ;;  %v605_v0 = vmov 0.0   ;;  %vm606_vm0 = vmmov 0   ;;  %v496_v1 = vld [vmem:[#allocation6 + $0x38] sm:$0xff]   ;;  %v497_v2 = vld [vmem:[#allocation6 + $0x30] sm:$0xff]   ;;  %v188_v22 = vlaneseq }
  0x29   :  { %446 = vmatprep.subr.bf16.mxu0 %v605_v0  ;;  %462 = vmatprep.mubr.msk.bf16.mxu0 %vm606_vm0, %v605_v0  ;;  %v504_v3 = vld [vmem:[#allocation8 + $0x38] sm:$0xff]   ;;  %v498_v4 = vld [vmem:[#allocation6 + $0x28] sm:$0xff]   ;;  %v505_v5 = vld [vmem:[#allocation8 + $0x30] sm:$0xff]   ;;  %s187_s15 = sxor.u32 1013904223, %s673_s0  ;;  %s607_s21 = smov [#allocation9]  }
  0x2a   :  { %466 = vmatprep.subr.bf16.mxu1 %v605_v0  ;;  %482 = vmatprep.mubr.msk.bf16.mxu1 %vm606_vm0, %v605_v0  ;;  %v499_v6 = vld [vmem:[#allocation6 + $0x20] sm:$0xff]   ;;  %v506_v7 = vld [vmem:[#allocation8 + $0x28] sm:$0xff]   ;;  %v500_v8 = vld [vmem:[#allocation6 + $0x18] sm:$0xff]   ;;  %v189_v23 = vshrl.u32 %v188_v22, 7  ;;  %v192_v25 = vand.u32 127, %v188_v22  ;;  %v195_v27 = vstv %s187_s15  ;;  %s385_s22 = sshll.u32 %s607_s21, 4  ;;  %s386_s22 = int_to_ptr.vmem [resolvable:$true] %s385_s22 }
  0x2b   :  { %447 = vmatpush3.bf16.xpose.msra.mxu0 %v496_v1  ;;  %467 = vmatpush3.bf16.xpose.msra.mxu1 %v504_v3  ;;  %v507_v9 = vld [vmem:[#allocation8 + $0x20] sm:$0xff]   ;;  %v501_v10 = vld [vmem:[#allocation6 + $0x10] sm:$0xff]   ;;  %v508_v11 = vld [vmem:[#allocation8 + $0x18] sm:$0xff]   ;;  %s572_s23 = scalar_lea.vmem %s386_s22, 256  ;;  %p577_p2 = scmp.lt.s32.totalorder %s386_s22, %s386_s22 }
  0x2c   :  { %448 = vmatprep.subr.bf16.mxu0 %v605_v0  ;;  %468 = vmatprep.subr.bf16.mxu1 %v605_v0  ;;  %v502_v12 = vld [vmem:[#allocation6 + $0x8] sm:$0xff]   ;;  %v509_v13 = vld [vmem:[#allocation8 + $0x10] sm:$0xff]   ;;  %v503_v14 = vld [vmem:[#allocation6] sm:$0xff]   ;;  %v190_v24 = vadd.s32 8, %v189_v23  ;;  %v193_v26 = vmul.u32 1640531527, %v189_v23  ;;  %p573_p1 = scmp.ne.s32.totalorder %s386_s22, %s572_s23  ;;  %p578_p3 = scmp.lt.s32.totalorder %s572_s23, %s572_s23 }
  0x2d   :  { %v67_v15 = vld [vmem:[#allocation3] sm:$0xff]  ;;  %v68_v16 = vld [vmem:[#allocation3 + $0x8] sm:$0xff]  ;;  %v510_v17 = vld [vmem:[#allocation8 + $0x8] sm:$0xff]   ;;  %v198_v30 = vmul.u32 2146121005, %v192_v25 }
  0x2e   :  { %v69_v18 = vmax.f32 %v67_v15, 0.0  ;;  %v70_v19 = vmax.f32 %v68_v16, 0.0  ;;  %v511_v21 = vld [vmem:[#allocation8] sm:$0xff]   ;;  %v194_v28 = vmul.u32 1640531527, %v190_v24  ;;  %v196_v29 = vadd.s32 %v195_v27, %v193_v26  ;;  %p579_p4 = por %p578_p3, %p577_p2 }
  0x2f   :  { %v398_v50 = vld [vmem:[%s676_s3] ss:$0 sm:$0xff]  ;;  %s344_s3 = sxor.u32 461845907, %s673_s0 }
  0x30   :  { %v71_v20 = vpack.c.bf16 %v70_v19, %v69_v18  ;;  %v197_v31 = vadd.s32 %v195_v27, %v194_v28  ;;  %v199_v32 = vadd.s32 %v198_v30, %v196_v29  ;;  %v413_v22 = vld [vmem:[%s678_s5] ss:$0 sm:$0xff]  ;;  %p580_p5 = pnand %p579_p4, %p573_p1 }
  0x32   :  { %v200_v33 = vadd.s32 %v198_v30, %v197_v31  ;;  %v407_v34 = vshrl.u32 %v199_v32, 16 }
  0x33   :  { %449 = vmatpush3.bf16.xpose.msra.mxu0 %v497_v2  ;;  %469 = vmatpush3.bf16.xpose.msra.mxu1 %v505_v5 }
  0x34   :  { %450 = vmatprep.subr.bf16.mxu0 %v605_v0  ;;  %470 = vmatprep.subr.bf16.mxu1 %v605_v0  ;;  %v408_v35 = vshrl.u32 %v200_v33, 16  ;;  %v205_v36 = vxor.u32 %v407_v34, %v199_v32 }
  0x36   :  { %v206_v37 = vxor.u32 %v408_v35, %v200_v33  ;;  %v207_v38 = vmul.u32 668265263, %v205_v36 }
  0x38   :  { %v208_v39 = vmul.u32 668265263, %v206_v37  ;;  %v409_v40 = vshrl.u32 %v207_v38, 13 }
  0x3a   :  { %v410_v41 = vshrl.u32 %v208_v39, 13  ;;  %v213_v42 = vxor.u32 %v409_v40, %v207_v38 }
  0x3b   :  { %451 = vmatpush3.bf16.xpose.msra.mxu0 %v498_v4  ;;  %471 = vmatpush3.bf16.xpose.msra.mxu1 %v506_v7 }
  0x3c   :  { %452 = vmatprep.subr.bf16.mxu0 %v605_v0  ;;  %472 = vmatprep.subr.bf16.mxu1 %v605_v0  ;;  %v214_v43 = vxor.u32 %v410_v41, %v208_v39  ;;  %v215_v44 = vmul.u32 374761393, %v213_v42 }
  0x3e   :  { %v216_v45 = vmul.u32 374761393, %v214_v43  ;;  %v411_v46 = vshrl.u32 %v215_v44, 16 }
  0x40   :  { %v412_v47 = vshrl.u32 %v216_v45, 16  ;;  %v221_v48 = vxor.u32 %v411_v46, %v215_v44 }
  0x42   :  { %v222_v49 = vxor.u32 %v412_v47, %v216_v45  ;;  %v223_v51 = vand.u32 16777215, %v221_v48 }
  0x43   :  { %453 = vmatpush3.bf16.xpose.msra.mxu0 %v499_v6  ;;  %473 = vmatpush3.bf16.xpose.msra.mxu1 %v507_v9 }
  0x44   :  { %454 = vmatprep.subr.bf16.mxu0 %v605_v0  ;;  %474 = vmatprep.subr.bf16.mxu1 %v605_v0  ;;  %v224_v53 = vand.u32 16777215, %v222_v49  ;;  %vm225_vm1 = vcmp.ge.s32.totalorder %v223_v51, 1677722 }
  0x46   :  { %vm226_vm2 = vcmp.ge.s32.totalorder %v224_v53, 1677722 }
  0x4b   :  { %455 = vmatpush3.bf16.xpose.msra.mxu0 %v500_v8  ;;  %475 = vmatpush3.bf16.xpose.msra.mxu1 %v508_v11 }
  0x4c   :  { %456 = vmatprep.subr.bf16.mxu0 %v605_v0  ;;  %476 = vmatprep.subr.bf16.mxu1 %v605_v0 }
  0x53   :  { %457 = vmatpush3.bf16.xpose.msra.mxu0 %v501_v10  ;;  %477 = vmatpush3.bf16.xpose.msra.mxu1 %v509_v13 }
  0x54   :  { %458 = vmatprep.subr.bf16.mxu0 %v605_v0  ;;  %478 = vmatprep.subr.bf16.mxu1 %v605_v0 }
  0x5b   :  { %459 = vmatpush3.bf16.xpose.msra.mxu0 %v502_v12  ;;  %479 = vmatpush3.bf16.xpose.msra.mxu1 %v510_v17 }
  0x5c   :  { %460 = vmatprep.subr.bf16.mxu0 %v605_v0  ;;  %480 = vmatprep.subr.bf16.mxu1 %v605_v0  ;;  %v345_v0 = vstv %s344_s3 }
  0x5d   :  { %v346_v1 = vadd.s32 %v345_v0, %v193_v26  ;;  %v347_v3 = vadd.s32 %v345_v0, %v194_v28 }
  0x5f   :  { %v348_v2 = vadd.s32 %v346_v1, %v198_v30  ;;  %v349_v5 = vadd.s32 %v347_v3, %v198_v30 }
  0x61   :  { %v422_v4 = vshrl.u32 %v348_v2, 16  ;;  %v423_v7 = vshrl.u32 %v349_v5, 16 }
  0x63   :  { %461 = vmatpush3.bf16.xpose.msra.mxu0 %v503_v14  ;;  %481 = vmatpush3.bf16.xpose.msra.mxu1 %v511_v21  ;;  %v354_v6 = vxor.u32 %v422_v4, %v348_v2  ;;  %v355_v9 = vxor.u32 %v423_v7, %v349_v5 }
  0x65   :  { %v356_v8 = vmul.u32 668265263, %v354_v6  ;;  %v357_v11 = vmul.u32 668265263, %v355_v9 }
  0x67   :  { %v424_v10 = vshrl.u32 %v356_v8, 13  ;;  %v425_v13 = vshrl.u32 %v357_v11, 13 }
  0x69   :  { %v362_v12 = vxor.u32 %v424_v10, %v356_v8  ;;  %v363_v15 = vxor.u32 %v425_v13, %v357_v11 }
  0x6a   :  { %463 = vmatmul.mubr.bf16.vlgmr.msra.gmra.mxu0 %v71_v20 }
  0x6b   :  { %v364_v14 = vmul.u32 374761393, %v362_v12  ;;  %v365_v17 = vmul.u32 374761393, %v363_v15 }
  0x6d   :  { %v426_v16 = vshrl.u32 %v364_v14, 16  ;;  %v427_v19 = vshrl.u32 %v365_v17, 16 }
  0x6f   :  { %v370_v18 = vxor.u32 %v426_v16, %v364_v14  ;;  %v371_v21 = vxor.u32 %v427_v19, %v365_v17 }
  0x71   :  { %v372_v20 = vand.u32 16777215, %v370_v18  ;;  %v373_v24 = vand.u32 16777215, %v371_v21 }
  0x73   :  { %vm374_vm3 = vcmp.ge.s32.totalorder %v372_v20, 1677722  ;;  %vm375_vm4 = vcmp.ge.s32.totalorder %v373_v24, 1677722 }
 0x12a   :  { %v177_v52 = vpop.f32.mrf.mxu0 }
 0x12b   :  { %v178_v54 = vadd.f32 %v398_v50, %v177_v52 }
 0x12c   :  { %v464_v55 = vpop.f32.mrf.mxu0 }
 0x12d   :  { %v227_v57 = vsel %vm225_vm1, %v178_v54, 0.0 }
 0x12e   :  { %v180_v56 = vpop.f32.mrf.mxu0  ;;  %v229_v61 = vmax.f32 %v227_v57, 0.0 }
 0x12f   :  { %v181_v58 = vadd.f32 %v398_v50, %v180_v56 }
 0x130   :  { %v465_v59 = vpop.f32.mrf.mxu0 }
 0x131   :  { %v228_v60 = vsel %vm226_vm2, %v181_v58, 0.0 }
 0x132   :  { %v230_v62 = vmax.f32 %v228_v60, 0.0 }
 0x134   :  { %v231_v63 = vpack.c.bf16 %v230_v62, %v229_v61 }
 0x136   :  { %483 = vmatmul.mubr.bf16.vlgmr.msra.gmra.mxu1 %v231_v63 }
 0x1f6   :  { %v337_v23 = vpop.f32.mrf.mxu1 }
 0x1f7   :  { %v338_v25 = vadd.f32 %v413_v22, %v337_v23 }
 0x1f8   :  { %v484_v26 = vpop.f32.mrf.mxu1 }
 0x1f9   :  { %v376_v27 = vsel %vm374_vm3, %v338_v25, 0.0 }
 0x1fa   :  { %378 = vst [vmem:[#allocation9] sm:$0xff] %v376_v27  ;;  %v340_v28 = vpop.f32.mrf.mxu1 }
 0x1fb   :  { %v341_v29 = vadd.f32 %v413_v22, %v340_v28 }
 0x1fc   :  { %v485_v30 = vpop.f32.mrf.mxu1 }
 0x1fd   :  { %v377_v31 = vsel %vm375_vm4, %v341_v29, 0.0 }
 0x1fe   :  { %379 = vst [vmem:[#allocation9 + $0x8] sm:$0xff] %v377_v31 }
 0x1ff   :  { %583 = shalt.err (!%p580_p5)
}
 0x200   :  { %391 = dma.vmem_to_hbm [thread:$0]  %s386_s22, 256, %s679_s6, [#allocation5], %s602_s7, %s602_s7, %s603_s8  }
 0x201   :  { %596 = dma.done.wait [#allocation5], 256  }
 0x202   :  { %597 = vsyncadd [#allocation5], 4294967040 }
 0x203   :  { %395 = vsyncpa [#allocation4], 1 }
 0x204   :  { %396 = vsyncpa [#allocation7], 1 }
 0x205   :  { %397 = vsyncpa [#allocation5], 1 }

</bundles_post_ra>
